<compile_context>
chip_gen: v7x
topology: tpu7x:2x2x1
jax: 0.10.0
libtpu: 0.0.40
codegen_flags: <defaults>
</compile_context>

<pallas_src>
import math
import functools

import jax
import jax.numpy as jnp
from jax import lax
from jax.experimental import pallas as pl
from jax.experimental.pallas import tpu as pltpu


_INV_SQRT2 = 0.7071067811865476  # hoisted constant: multiply, not divide


def _gelu_exact_f32(x):
    # torch.nn.GELU() default = exact erf formulation (computed in f32)
    return 0.5 * x * (1.0 + lax.erf(x * _INV_SQRT2))


# ---------------------------------------------------------------------------
# Kernels
# ---------------------------------------------------------------------------

def mlp_resident_kernel(x_ref, w1_ref, b1_ref, w2_ref, b2_ref, o_ref):
    # x_ref:  (TM, C)  streamed token tile (input dtype, usually f32)
    # w1_ref: (C, H)   c_fc weight, VMEM-resident (single-buffered)
    # b1_ref: (1, H)   f32 bias, resident
    # w2_ref: (H, C)   c_proj weight, resident
    # b2_ref: (1, C)   f32 bias, resident
    # o_ref:  (TM, C)  output tile
    x = x_ref[...].astype(w1_ref.dtype)          # in-kernel cast: x is read from HBM exactly once
    h = jnp.dot(x, w1_ref[...], preferred_element_type=jnp.float32)
    h = _gelu_exact_f32(h + b1_ref[...])         # bias-add + exact-erf GELU in f32
    y = jnp.dot(h.astype(w2_ref.dtype), w2_ref[...], preferred_element_type=jnp.float32)
    # TODO(synk): training-mode dropout (p>0) would need pltpu.prng_seed/prng_random_bits masking;
    #             inference (eval mode) = identity.
    o_ref[...] = (y + b2_ref[...]).astype(o_ref.dtype)


def mlp_htiled_kernel(x_ref, w1_ref, b1_ref, w2_ref, b2_ref, o_ref, acc_ref):
    # Hidden-dim tiled plan: grid = (M tiles ["parallel"], H tiles ["arbitrary"]).
    # x_ref (TM,C) constant across H steps; w1 (C,TH), b1 (1,TH), w2 (TH,C) stream per H tile.
    # acc_ref (TM,C) f32 scratch accumulates partial c_proj results.
    hi = pl.program_id(1)

    @pl.when(hi == 0)
    def _():
        acc_ref[...] = jnp.zeros_like(acc_ref)

    x = x_ref[...].astype(w1_ref.dtype)
    t = jnp.dot(x, w1_ref[...], preferred_element_type=jnp.float32)
    t = _gelu_exact_f32(t + b1_ref[...])
    acc_ref[...] += jnp.dot(t.astype(w2_ref.dtype), w2_ref[...],
                            preferred_element_type=jnp.float32)

    @pl.when(hi == pl.num_programs(1) - 1)
    def _():
        o_ref[...] = (acc_ref[...] + b2_ref[...]).astype(o_ref.dtype)


# ---------------------------------------------------------------------------
# Wrapper
# ---------------------------------------------------------------------------

def _nbytes(shape, dtype):
    return math.prod(shape) * jnp.dtype(dtype).itemsize


def _vmem_capacity_bytes():
    # Trace-time hardware query; fall back to the most conservative (v7x per-TC) capacity.
    try:
        return int(pltpu.get_tpu_info().vmem_capacity_bytes)
    except Exception:
        return 64 << 20


def _choose_tile_m(M, tm):
    tm = max(8, (tm // 8) * 8)
    if M > tm:
        return tm
    # Small-M (decode-like): split into >=2 tiles so v7x megacore + DMA/compute overlap have work.
    if M >= 16:
        return max(8, (((M + 1) // 2 + 7) // 8) * 8)
    return max(8, ((M + 7) // 8) * 8)


def _choose_tile_h(H, th):
    # Largest multiple of 128 that divides H and is <= th (falls back to full H).
    th = min(th, H)
    t = max(128, (th // 128) * 128)
    while t >= 128:
        if H % t == 0:
            return t
        t -= 128
    return H


@functools.partial(
    jax.jit,
    static_argnames=("tm", "th", "matmul_dtype", "out_dtype", "force_h_tiled"))
def mlp_forward(x, w1, b1, w2, b2, *, tm=None, th=512,
                matmul_dtype=jnp.bfloat16, out_dtype=jnp.float32,
                force_h_tiled=False):
    """x: (B, T, C). Weights stored as (in, out). Returns (B, T, C) in out_dtype."""
    B, T, C = x.shape
    H = w1.shape[1]
    M = B * T

    capacity = _vmem_capacity_bytes()
    budget = (capacity * 7) // 8   # headroom for Mosaic internal scratch / semaphores / spill slots

    if tm is None:
        # v5e/v6e (128 MiB VMEM): bigger token tiles amortize per-grid-step overhead; v7x (64 MiB): 512.
        tm = 1024 if capacity >= (100 << 20) else 512
    tile_m = _choose_tile_m(M, tm)
    m_tiles = pl.cdiv(M, tile_m)
    m_pad = m_tiles * tile_m

    x2 = x.reshape(M, C)
    if m_pad != M:
        x2 = jnp.pad(x2, ((0, m_pad - M), (0, 0)))
    # NOTE: x is deliberately NOT cast here; the kernel casts in VMEM (halves x HBM traffic).

    # No-ops when callers already hold bf16 master weights (recommended).
    w1c = w1.astype(matmul_dtype)
    w2c = w2.astype(matmul_dtype)
    b1c = b1.reshape(1, H).astype(jnp.float32)
    b2c = b2.reshape(1, C).astype(jnp.float32)

    x_tile_bytes = _nbytes((tile_m, C), x2.dtype)
    o_tile_bytes = _nbytes((tile_m, C), out_dtype)
    io_bytes = 2 * x_tile_bytes + 2 * o_tile_bytes          # double-buffered streamed tiles

    # Fully-resident plan cost: weights single-buffered (pl.Buffered(1)) -> no 2x factor.
    w_res_bytes = (_nbytes((C, H), matmul_dtype) + _nbytes((H, C), matmul_dtype)
                   + _nbytes((1, H), jnp.float32) + _nbytes((1, C), jnp.float32))
    tmp_res = (_nbytes((tile_m, H), jnp.float32) + _nbytes((tile_m, H), matmul_dtype)
               + _nbytes((tile_m, C), matmul_dtype))
    need_res = int(1.2 * (w_res_bytes + io_bytes + tmp_res)) + (2 << 20)

    # Switch to H-tiling when fully-resident weights + hidden temp would not fit (e.g. large C on v7x).
    use_htiled = force_h_tiled or (need_res > budget and H % 128 == 0)

    cost = pl.CostEstimate(
        flops=2 * m_pad * C * H * 2,                     # two matmuls
        transcendentals=m_pad * H,                       # erf over the hidden activation
        bytes_accessed=(_nbytes((m_pad, C), x2.dtype) + w_res_bytes
                        + _nbytes((m_pad, C), out_dtype)),
    )

    if not use_htiled:
        vmem_limit = int(min(max(need_res, 16 << 20), budget))
        grid = (m_tiles,)
        in_specs = [
            pl.BlockSpec((tile_m, C), lambda i: (i, 0)),                                      # x streamed
            pl.BlockSpec((C, H), lambda i: (0, 0), pipeline_mode=pl.Buffered(1)),             # w1 resident
            pl.BlockSpec((1, H), lambda i: (0, 0), pipeline_mode=pl.Buffered(1)),             # b1 resident
            pl.BlockSpec((H, C), lambda i: (0, 0), pipeline_mode=pl.Buffered(1)),             # w2 resident
            pl.BlockSpec((1, C), lambda i: (0, 0), pipeline_mode=pl.Buffered(1)),             # b2 resident
        ]
        out_specs = pl.BlockSpec((tile_m, C), lambda i: (i, 0))
        scratch_shapes = ()
        kernel = mlp_resident_kernel
        dim_sem = ("parallel",)
    else:
        tile_h = _choose_tile_h(H, th)
        h_tiles = H // tile_h
        wt_bytes = (2 * (_nbytes((C, tile_h), matmul_dtype) + _nbytes((tile_h, C), matmul_dtype)
                         + _nbytes((1, tile_h), jnp.float32))
                    + _nbytes((1, C), jnp.float32))
        acc_bytes = _nbytes((tile_m, C), jnp.float32)
        tmp_ht = (_nbytes((tile_m, tile_h), jnp.float32) + _nbytes((tile_m, tile_h), matmul_dtype)
                  + _nbytes((tile_m, C), matmul_dtype))
        need_ht = int(1.2 * (wt_bytes + io_bytes + acc_bytes + tmp_ht)) + (2 << 20)
        vmem_limit = int(min(max(need_ht, 16 << 20), budget))
        grid = (m_tiles, h_tiles)                         # reduction (H) axis last / innermost
        in_specs = [
            pl.BlockSpec((tile_m, C), lambda i, h: (i, 0)),                                   # x: constant over h
            pl.BlockSpec((C, tile_h), lambda i, h: (0, h)),                                   # w1 tile streamed
            pl.BlockSpec((1, tile_h), lambda i, h: (0, h)),                                   # b1 tile streamed
            pl.BlockSpec((tile_h, C), lambda i, h: (h, 0)),                                   # w2 tile streamed
            pl.BlockSpec((1, C), lambda i, h: (0, 0), pipeline_mode=pl.Buffered(1)),          # b2 resident
        ]
        out_specs = pl.BlockSpec((tile_m, C), lambda i, h: (i, 0))
        scratch_shapes = (pltpu.VMEM((tile_m, C), jnp.float32),)
        kernel = mlp_htiled_kernel
        dim_sem = ("parallel", "arbitrary")

    out = pl.pallas_call(
        kernel,
        out_shape=jax.ShapeDtypeStruct((m_pad, C), out_dtype),
        grid_spec=pltpu.PrefetchScalarGridSpec(
            num_scalar_prefetch=0,
            grid=grid,
            in_specs=in_specs,
            out_specs=out_specs,
            scratch_shapes=scratch_shapes,
        ),
        compiler_params=pltpu.CompilerParams(
            dimension_semantics=dim_sem,
            vmem_limit_bytes=vmem_limit,
        ),
        cost_estimate=cost,
    )(x2, w1c, b1c, w2c, b2c)

    if m_pad != M:
        out = out[:M]
    return out.reshape(B, T, C)


# ---------------------------------------------------------------------------
# Init + reference + self-test
# ---------------------------------------------------------------------------

def init_mlp_params(key, n_embd):
    """Deterministic init mirroring nn.Linear defaults (uniform +/- 1/sqrt(fan_in))."""
    hidden = 4 * n_embd
    k1, k2, k3, k4 = jax.random.split(key, 4)
    bound1 = 1.0 / math.sqrt(n_embd)
    bound2 = 1.0 / math.sqrt(hidden)
    # stored as (in, out) so the kernel computes x @ W without transposing
    w1 = jax.random.uniform(k1, (n_embd, hidden), jnp.float32, -bound1, bound1)
    b1 = jax.random.uniform(k2, (1, hidden), jnp.float32, -bound1, bound1)
    w2 = jax.random.uniform(k3, (hidden, n_embd), jnp.float32, -bound2, bound2)
    b2 = jax.random.uniform(k4, (1, n_embd), jnp.float32, -bound2, bound2)
    return w1, b1, w2, b2


def _reference(x, w1, b1, w2, b2):
    # plain-JAX f32 reference (exact-erf GELU, eval-mode dropout = identity)
    B, T, C = x.shape
    h = _gelu_exact_f32(x.reshape(B * T, C) @ w1 + b1)
    return (h @ w2 + b2).reshape(B, T, C)


if __name__ == "__main__":
    key = jax.random.PRNGKey(0)
    kx1, kp1, kx2, kp2 = jax.random.split(key, 4)

    # --- Case 1: tiny shapes, fully-resident plan (single-buffered weights) ---
    B, T, n_embd = 2, 8, 32          # hidden = 128, M = 16 -> two 8-row tiles
    x = jax.random.normal(kx1, (B, T, n_embd), jnp.float32)
    w1, b1, w2, b2 = init_mlp_params(kp1, n_embd)
    y_ref = _reference(x, w1, b1, w2, b2)

    # f32 matmul path: semantics check (tolerance loosened for MXU f32-pass rounding on TPU)
    y_f32 = mlp_forward(x, w1, b1, w2, b2, matmul_dtype=jnp.float32)
    jax.block_until_ready(y_f32)
    assert jnp.allclose(y_f32, y_ref, atol=1e-4, rtol=1e-4), "f32 resident path mismatch"

    # bf16 matmul path (default perf config)
    y_bf16 = mlp_forward(x, w1, b1, w2, b2)
    jax.block_until_ready(y_bf16)
    assert jnp.allclose(y_bf16, y_ref, atol=2e-2, rtol=2e-2), "bf16 resident path mismatch"

    # --- Case 2: exercise the hidden-dim-tiled accumulator plan (used for large C on v7x) ---
    B2, T2, C2 = 2, 64, 128          # hidden = 512 -> two 256-wide H tiles, two 64-row M tiles
    x_b = jax.random.normal(kx2, (B2, T2, C2), jnp.float32)
    params_b = init_mlp_params(kp2, C2)
    y2_ref = _reference(x_b, *params_b)
    y2 = mlp_forward(x_b, *params_b, th=256, force_h_tiled=True)
    jax.block_until_ready(y2)
    assert jnp.allclose(y2, y2_ref, atol=2e-2, rtol=2e-2), "bf16 H-tiled path mismatch"

    print("KERNEL_OK")
</pallas_src>

<mosaic_0001>
module attributes {stable_mosaic.version = 11 : i64} {
  func.func @mlp_resident_kernel(%arg0: i32, %arg1: memref<8x32xf32, #tpu.memory_space<vmem>>, %arg2: memref<32x128xf32, #tpu.memory_space<vmem>>, %arg3: memref<1x128xf32, #tpu.memory_space<vmem>>, %arg4: memref<128x32xf32, #tpu.memory_space<vmem>>, %arg5: memref<1x32xf32, #tpu.memory_space<vmem>>, %arg6: memref<8x32xf32, #tpu.memory_space<vmem>>) attributes {dimension_semantics = [#tpu.dimension_semantics<parallel>], iteration_bounds = array<i64: 2>, scalar_prefetch = 0 : i64, scratch_operands = 0 : i64, tpu.core_type = #tpu.core_type<tc>, window_params = [{transform_indices = @transform_0, window_bounds = array<i64: 8, 32>}, {pipeline_mode = #tpu.pipeline_mode<synchronous>, transform_indices = @transform_1, window_bounds = array<i64: 32, 128>}, {pipeline_mode = #tpu.pipeline_mode<synchronous>, transform_indices = @transform_2, window_bounds = array<i64: 1, 128>}, {pipeline_mode = #tpu.pipeline_mode<synchronous>, transform_indices = @transform_3, window_bounds = array<i64: 128, 32>}, {pipeline_mode = #tpu.pipeline_mode<synchronous>, transform_indices = @transform_4, window_bounds = array<i64: 1, 32>}, {transform_indices = @transform_5, window_bounds = array<i64: 8, 32>}]} {
    %c0 = arith.constant 0 : index
    %c0_0 = arith.constant 0 : index
    %0 = vector.load %arg1[%c0, %c0_0] : memref<8x32xf32, #tpu.memory_space<vmem>>, vector<8x32xf32>
    %c0_1 = arith.constant 0 : index
    %c0_2 = arith.constant 0 : index
    %1 = vector.load %arg2[%c0_1, %c0_2] : memref<32x128xf32, #tpu.memory_space<vmem>>, vector<32x128xf32>
    %cst = arith.constant dense<0.000000e+00> : vector<8x128xf32>
    %2 = tpu.matmul %0, %1, %cst {dimension_numbers = #tpu.dot_dimension_numbers<[1], [0], [0], [1], [0, 0, 1, 1], [], []>} : vector<8x32xf32>, vector<32x128xf32>, vector<8x128xf32> -> vector<8x128xf32>
    %c0_3 = arith.constant 0 : index
    %c0_4 = arith.constant 0 : index
    %3 = vector.load %arg3[%c0_3, %c0_4] : memref<1x128xf32, #tpu.memory_space<vmem>>, vector<1x128xf32>
    %4 = vector.broadcast %3 : vector<1x128xf32> to vector<8x128xf32>
    %5 = arith.addf %2, %4 : vector<8x128xf32>
    %cst_5 = arith.constant 5.000000e-01 : f32
    %6 = vector.broadcast %cst_5 : f32 to vector<8x128xf32>
    %7 = arith.mulf %6, %5 : vector<8x128xf32>
    %cst_6 = arith.constant 0.707106769 : f32
    %8 = vector.broadcast %cst_6 : f32 to vector<8x128xf32>
    %9 = arith.mulf %5, %8 : vector<8x128xf32>
    %10 = math.erf %9 : vector<8x128xf32>
    %cst_7 = arith.constant 1.000000e+00 : f32
    %11 = vector.broadcast %cst_7 : f32 to vector<8x128xf32>
    %12 = arith.addf %11, %10 : vector<8x128xf32>
    %13 = arith.mulf %7, %12 : vector<8x128xf32>
    %c0_8 = arith.constant 0 : index
    %c0_9 = arith.constant 0 : index
    %14 = vector.load %arg4[%c0_8, %c0_9] : memref<128x32xf32, #tpu.memory_space<vmem>>, vector<128x32xf32>
    %cst_10 = arith.constant dense<0.000000e+00> : vector<8x32xf32>
    %15 = tpu.matmul %13, %14, %cst_10 {dimension_numbers = #tpu.dot_dimension_numbers<[1], [0], [0], [1], [0, 0, 1, 1], [], []>} : vector<8x128xf32>, vector<128x32xf32>, vector<8x32xf32> -> vector<8x32xf32>
    %c0_11 = arith.constant 0 : index
    %c0_12 = arith.constant 0 : index
    %16 = vector.load %arg5[%c0_11, %c0_12] : memref<1x32xf32, #tpu.memory_space<vmem>>, vector<1x32xf32>
    %17 = vector.broadcast %16 : vector<1x32xf32> to vector<8x32xf32>
    %18 = arith.addf %15, %17 : vector<8x32xf32>
    %c0_13 = arith.constant 0 : index
    %c0_14 = arith.constant 0 : index
    %19 = vector.load %arg6[%c0_13, %c0_14] : memref<8x32xf32, #tpu.memory_space<vmem>>, vector<8x32xf32>
    tpu.vector_store %arg6[%c0_13, %c0_14], %18 {strides = array<i32>} : memref<8x32xf32, #tpu.memory_space<vmem>>, vector<8x32xf32>,
    return
  }
  func.func @transform_0(%arg0: i32) -> (i32, i32) {
    %c0_i32 = arith.constant 0 : i32
    %c0_i32_0 = arith.constant 0 : i32
    return %arg0, %c0_i32 : i32, i32
  }
  func.func @transform_1(%arg0: i32) -> (i32, i32) {
    %c0_i32 = arith.constant 0 : i32
    %c0_i32_0 = arith.constant 0 : i32
    %c0_i32_1 = arith.constant 0 : i32
    return %c0_i32, %c0_i32_0 : i32, i32
  }
  func.func @transform_2(%arg0: i32) -> (i32, i32) {
    %c0_i32 = arith.constant 0 : i32
    %c0_i32_0 = arith.constant 0 : i32
    %c0_i32_1 = arith.constant 0 : i32
    return %c0_i32, %c0_i32_0 : i32, i32
  }
  func.func @transform_3(%arg0: i32) -> (i32, i32) {
    %c0_i32 = arith.constant 0 : i32
    %c0_i32_0 = arith.constant 0 : i32
    %c0_i32_1 = arith.constant 0 : i32
    return %c0_i32, %c0_i32_0 : i32, i32
  }
  func.func @transform_4(%arg0: i32) -> (i32, i32) {
    %c0_i32 = arith.constant 0 : i32
    %c0_i32_0 = arith.constant 0 : i32
    %c0_i32_1 = arith.constant 0 : i32
    return %c0_i32, %c0_i32_0 : i32, i32
  }
  func.func @transform_5(%arg0: i32) -> (i32, i32) {
    %c0_i32 = arith.constant 0 : i32
    %c0_i32_0 = arith.constant 0 : i32
    return %arg0, %c0_i32 : i32, i32
  }
}

</mosaic_0001>

<bundles_post_ra>
// kernel: mlp_forward.1
= control target key start
LH: loop header
LB: loop body
LE: loop exit
PB: predicated region body
PF: predicated region fallthrough
CT: control target
= control target key end

     0   :  { %10 = vsyncpa [#allocation3], 0  ;;  %s899_s0 = inlined_call_operand.vmem [shape: f32[16,32], index: 0, kind: input, shape index: {}]   ;;  %s900_s1 = inlined_call_operand.vmem [shape: f32[32,128], index: 1, kind: input, shape index: {}]   ;;  %s901_s2 = inlined_call_operand.vmem [shape: f32[1,128], index: 2, kind: input, shape index: {}]   ;;  %s902_s3 = inlined_call_operand.vmem [shape: f32[128,32], index: 3, kind: input, shape index: {}]   ;;  %s903_s4 = inlined_call_operand.vmem [shape: f32[1,32], index: 4, kind: input, shape index: {}]   ;;  %s904_s5 = inlined_call_operand.hbm [shape: f32[16,32], index: 5, kind: output, shape index: {}]  }
   0x1   :  { %12 = vsyncpa [#allocation3 + $0x1], 0  ;;  %s731_s18 = smov 0   ;;  %s733_s19 = smov 0  }
   0x2   :  { %s735_s20 = smov 0   ;;  %s737_s21 = smov 0  }
   0x3 LB: > { %s752_s22 = sadd.s32 4294967295, %s695_s21   ;;  %s478_s23 = sadd.s32 4294967294, %s695_s21   ;;  %s695_s21 = sphi %s737_s21, %s910_s21   ;;  %s691_s20 = sphi %s735_s20, %s909_s20   ;;  %s687_s19 = sphi %s733_s19, %s908_s19   ;;  %s683_s18 = sphi %s731_s18, %s907_s18  }
   0x4   : > { %s756_s24 = sadd.s32 1, %s695_s21   ;;  %s135_s25 = sadd.s32 1, %s691_s20 }
   0x5   : > { %s132_s26 = ssub.s32 %s695_s21, %s756_s24  ;;  %p145_p0 = scmp.ne.s32.totalorder %s691_s20, %s687_s19 }
   0x6   : > { %p133_p1 = scmp.eq.s32.totalorder %s132_s26, 0  ;;  %p146_p2 = scmp.eq.s32.totalorder %s752_s22, 1 }
   0x7   : > { %p151_p3 = scmp.ne.s32.totalorder %s687_s19, %s683_s18  ;;  %p152_p4 = scmp.eq.s32.totalorder %s478_s23, 1 }
   0x8   : > { %s767_s27 = scalar_select %p133_p1, %s691_s20, %s135_s25  }
   0x9   : > { %p769_p5 = por %p146_p2, %p145_p0  ;;  %p773_p6 = por %p152_p4, %p151_p3 }
   0xa   : > { %p481_p7 = scmp.ge.s32.totalorder %s695_s21, 1  ;;  %p189_p8 = scmp.lt.s32.totalorder %s695_s21, 3 }
   0xc   : > { %p190_p9 = pnand %p481_p7, %p189_p8 }
   0xd   : > { %v221_v0 = vld [vmem:[%s900_s1] sm:$0xff] (!%p190_p9)  ;;  %v222_v1 = vld [vmem:[%s900_s1 + $0x8] sm:$0xff] (!%p190_p9)  ;;  %v223_v2 = vld [vmem:[%s900_s1 + $0x10] sm:$0xff] (!%p190_p9)  ;;  %v697_v3 = vmov (!%p190_p9), 0.0|0.0   ;;  %vm698_vm0 = vmmov (!%p190_p9), 0   ;;  %v699_v6 = vmov (!%p190_p9), 0.0  }
   0xe   : > { %193 = sbr.rel (%p190_p9) target bundleno = 485 (0x1e5), region = 40  ;;  %559 = vmatprep.subr.bf16.mxu0 (!%p190_p9), %v697_v3  ;;  %v560_v4 = vpack.c.bf16 (!%p190_p9), %v222_v1, %v221_v0  ;;  %v224_v5 = vld [vmem:[%s900_s1 + $0x18] sm:$0xff] (!%p190_p9)  ;;  %521 = vmatprep.mubr.msk.f32.mxu0 (!%p190_p9), %vm698_vm0, %v699_v6  ;;  %p216_p10 = scmp.lt.s32.totalorder (!%p190_p9), %s752_s22, 1  ;;  %v311_v7 = vld [vmem:[%s902_s3] sm:$0xff] (!%p190_p9)  ;;  %v312_v8 = vld [vmem:[%s902_s3 + $0x8] sm:$0xff] (!%p190_p9)  ;;  %vm232_vm1 = vcmask (!%p190_p9), 261120  }
   0xf   : > { %565 = vmatprep.subr.bf16.mxu1 (!%p190_p9), %v697_v3  ;;  %v566_v9 = vpack.c.bf16 (!%p190_p9), %v312_v8, %v311_v7  ;;  %v313_v10 = vld [vmem:[%s902_s3 + $0x10] sm:$0xff] (!%p190_p9)  ;;  %v314_v11 = vld [vmem:[%s902_s3 + $0x18] sm:$0xff] (!%p190_p9)  ;;  %556 = vmatprep.mubr.msk.f32.mxu1 (!%p190_p9), %vm698_vm0, %v699_v6  ;;  %v563_v12 = vpack.c.bf16 (!%p190_p9), %v224_v5, %v223_v2  ;;  %v315_v14 = vld [vmem:[%s902_s3 + $0x20] sm:$0xff] (!%p190_p9)  ;;  %s213_s26 = sand.u32 (!%p190_p9), 1, %s687_s19   ;;  %s488_s8 = sshll.u32 (!%p190_p9), %s752_s22, 7 }
  0x10   : > { %561 = vmatpush3.bf16.msra.mxu0 (!%p190_p9), %v560_v4  ;;  %v569_v13 = vpack.c.bf16 (!%p190_p9), %v314_v11, %v313_v10  ;;  %v316_v15 = vld [vmem:[%s902_s3 + $0x28] sm:$0xff] (!%p190_p9)  ;;  %v317_v18 = vld [vmem:[%s902_s3 + $0x30] sm:$0xff] (!%p190_p9)  ;;  %v318_v19 = vld [vmem:[%s902_s3 + $0x38] sm:$0xff] (!%p190_p9)  ;;  %s406_s14 = scalar_lea.sflag (!%p190_p9), [#allocation3], %s213_s26 }
  0x11   : > { %562 = vmatprep.subr.bf16.mxu0 (!%p190_p9), %v697_v3  ;;  %567 = vmatpush3.bf16.msra.mxu1 (!%p190_p9), %v566_v9  ;;  %v572_v17 = vpack.c.bf16 (!%p190_p9), %v316_v15, %v315_v14  ;;  %v575_v20 = vpack.c.bf16 (!%p190_p9), %v318_v19, %v317_v18  ;;  %v319_v21 = vld [vmem:[%s902_s3 + $0x40] sm:$0xff] (!%p190_p9)  ;;  %v320_v22 = vld [vmem:[%s902_s3 + $0x48] sm:$0xff] (!%p190_p9)  ;;  %v321_v24 = vld [vmem:[%s902_s3 + $0x50] sm:$0xff] (!%p190_p9) }
  0x12   : > { %568 = vmatprep.subr.bf16.mxu1 (!%p190_p9), %v697_v3  ;;  %v578_v23 = vpack.c.bf16 (!%p190_p9), %v320_v22, %v319_v21  ;;  %v322_v25 = vld [vmem:[%s902_s3 + $0x58] sm:$0xff] (!%p190_p9)  ;;  %v323_v27 = vld [vmem:[%s902_s3 + $0x60] sm:$0xff] (!%p190_p9)  ;;  %v324_v28 = vld [vmem:[%s902_s3 + $0x68] sm:$0xff] (!%p190_p9) }
  0x13   : > { %v581_v26 = vpack.c.bf16 (!%p190_p9), %v322_v25, %v321_v24  ;;  %v584_v29 = vpack.c.bf16 (!%p190_p9), %v324_v28, %v323_v27  ;;  %v325_v30 = vld [vmem:[%s902_s3 + $0x70] sm:$0xff] (!%p190_p9)  ;;  %v326_v31 = vld [vmem:[%s902_s3 + $0x78] sm:$0xff] (!%p190_p9)  ;;  %v484_v33 = vld [vmem:[%s901_s2] ss:$0 sm:$0xff] (!%p190_p9) }
  0x14   : > { %564 = vmatpush3.bf16.msra.mxu0 (!%p190_p9), %v563_v12  ;;  %v587_v32 = vpack.c.bf16 (!%p190_p9), %v326_v31, %v325_v30  ;;  %v486_v42 = vld [vmem:[%s903_s4] ss:$0 sm:$0xff] (!%p190_p9) }
  0x15   : > { %s217_s30 = scalar_select %p216_p10, %s752_s22, 1  ;;  %570 = vmatpush3.bf16.msra.mxu1 %v569_v13 }
  0x16   : > { %571 = vmatprep.subr.bf16.mxu1 %v697_v3  ;;  %s700_s22 = smov [#allocation2]  }
  0x17   : > { %s483_s6 = sshll.u32 %s217_s30, 3  ;;  %s482_s30 = sshll.u32 %s213_s26, 3 }
  0x18   : > { %s219_s13 = scalar_lea.vmem %s899_s0, %s483_s6  ;;  %s215_s9 = scalar_lea.vmem [#allocation2], %s482_s30 }
  0x19   : > { %v220_v16 = vld [vmem:[%s219_s13] sm:$0xff]  ;;  %573 = vmatpush3.bf16.msra.mxu1 %v572_v17  ;;  %s419_s10 = sshll.u32 %s215_s9, 4  ;;  %s856_s13 = scalar_lea.hbm %s904_s5, %s488_s8  ;;  %s858_s10 = int_to_ptr.vmem [resolvable:$true] %s419_s10 }
  0x1a   : > { %522 = vmatmul.mubr.msk.f32.vlgmr.msra.gmra.mrb[0].mxu0 %vm232_vm1, %v220_v16  ;;  %574 = vmatprep.subr.bf16.mxu1 %v697_v3  ;;  %s633_s15 = scalar_lea.vmem %s858_s10, 128  ;;  %s637_s16 = sshll.u32 %s700_s22, 4  ;;  %s638_s16 = int_to_ptr.vmem [resolvable:$false] %s637_s16 }
  0x1b   : > { %p634_p11 = scmp.ne.s32.totalorder %s858_s10, %s633_s15  ;;  %s639_s17 = scalar_lea.vmem %s638_s16, 256 }
  0x1c   : > { %p640_p0 = scmp.lt.s32.totalorder %s858_s10, %s638_s16  ;;  %p641_p1 = scmp.lt.s32.totalorder %s639_s17, %s633_s15 }
  0x1d   : > { %576 = vmatpush3.bf16.msra.mxu1 %v575_v20  ;;  %p635_p12 = pnand %p634_p11, %p769_p5 }
  0x1e   : > { %577 = vmatprep.subr.bf16.mxu1 %v697_v3  ;;  %p642_p2 = por %p641_p1, %p640_p0 }
  0x1f   : > { %p636_p13 = pneg %p635_p12 }
  0x21   : > { %579 = vmatpush3.bf16.msra.mxu1 %v578_v23  ;;  %p643_p3 = pnand %p642_p2, %p636_p13 }
  0x22   : > { %580 = vmatprep.subr.bf16.mxu1 %v697_v3 }
  0x25   : > { %582 = vmatpush3.bf16.msra.mxu1 %v581_v26 }
  0x26   : > { %583 = vmatprep.subr.bf16.mxu1 %v697_v3 }
  0x29   : > { %585 = vmatpush3.bf16.msra.mxu1 %v584_v29 }
  0x2a   : > { %586 = vmatprep.subr.bf16.mxu1 %v697_v3 }
  0x2d   : > { %588 = vmatpush3.bf16.msra.mxu1 %v587_v32 }
  0xed   : > { %v302_v34 = vpop.f32.mrb[0].mxu0 }
  0xee   : > { %v303_v35 = vadd.f32 %v484_v33, %v302_v34  ;;  %v523_v36 = vpop.f32.mrb[1].mxu0 }
  0xf0   : > { %v307_v37 = vmul.f32 0.70710677, %v303_v35  ;;  %v306_v39 = vmul.f32 0.5, %v303_v35 }
  0xf2   : > { %631 = verf.f32 %v307_v37 }
  0xfc   : > { %v632_v38 = vpop.eup %631 }
  0xfd   : > { %v309_v40 = vadd.f32 1.0, %v632_v38 }
  0xff   : > { %v310_v41 = vmul.f32 %v309_v40, %v306_v39 }
 0x101   : > { %557 = vmatmul.mubr.f32.vlgmr.msra.gmra.mrb[0].mxu1 %v310_v41 }
 0x1d4   : > { %v400_v43 = vpop.f32.mrb[0].mxu1 }
 0x1d5   : > { %v401_v44 = vadd.f32 %v486_v42, %v400_v43  ;;  %v558_v45 = vpop.f32.mrb[1].mxu1 }
 0x1d7   : > { %404 = vst.msk [vmem:[%s215_s9] sm:$0xff] %vm232_vm1, %v401_v44 }
 0x1d8   : > { %646 = shalt.err (!%p643_p3)
}
 0x1d9   : > { %s647_s23 = scalar_lea.hbm %s856_s13, 128  ;;  %s651_s30 = scalar_lea.hbm %s904_s5, 256 }
 0x1da   : > { %p648_p4 = scmp.ne.s32.totalorder %s856_s13, %s647_s23  ;;  %p652_p9 = scmp.lt.u32.totalorder %s856_s13, %s904_s5 }
 0x1db   : > { %p653_p10 = scmp.lt.u32.totalorder %s651_s30, %s647_s23  ;;  %p655_p12 = scmp.lt.u32.totalorder %s647_s23, %s856_s13 }
 0x1dc   : > { %p649_p7 = pnand %p648_p4, %p769_p5 }
 0x1dd   : > { %p654_p11 = por %p653_p10, %p652_p9 }
 0x1de   : > { %p650_p8 = pneg %p649_p7 }
 0x1df   : > { %p656_p13 = por %p655_p12, %p654_p11 }
 0x1e1   : > { %p657_p0 = pnand %p656_p13, %p650_p8 }
 0x1e3   : > { %660 = shalt.err (!%p657_p0)
}
 0x1e4   : > { %589 = dma.vmem_to_hbm [thread:$0]  (%p769_p5), %s858_s10, 128, %s856_s13, %s406_s14  }
 0x1e5 PF: > { %p595_p1 = scmp.ge.s32.totalorder %s695_s21, 2  ;;  %s431_s8 = sand.u32 1, %s683_s18  }
 0x1e6   : > { %s432_s9 = scalar_lea.sflag [#allocation3], %s431_s8 }
 0x1e7   : > { %p592_p2 = pnand %p595_p1, %p773_p6 }
 0x1e9   : > { %678 = dma.done.wait (!%p592_p2), %s432_s9, 128  }
 0x1ea   : > { %680 = vsyncadd (!%p592_p2), %s432_s9, 4294967168  ;;  %p15_p3 = scmp.ge.s32.totalorder %s756_s24, 4   ;;  %s907_s18 = smov %s687_s19 }
 0x1eb   : > { %s908_s19 = smov %s691_s20  ;;  %s909_s20 = smov %s767_s27 }
 0x1ec   : > { %s910_s21 = smov %s756_s24  ;;  %17 = sbr.rel (!%p15_p3) target bundleno = 3 (0x3), region = 75 }
 0x1f3   :  { %437 = vsyncpa [#allocation3], 1 }
 0x1f4   :  { %439 = vsyncpa [#allocation3 + $0x1], 1 }

</bundles_post_ra>
